<compile_context>
chip_gen: v5e
topology: v5e:2x2
jax: 0.10.0
libtpu: 0.0.40
codegen_flags: <defaults>
</compile_context>

<pallas_src>
import jax
import jax.numpy as jnp
from jax.experimental import pallas as pl
from jax.experimental.pallas import tpu as pltpu

_LANE = 128
_SUBLANE = 8


def _round_up(v, m):
    return ((v + m - 1) // m) * m


def decoder_kernel(x_ref, w_ref, b_ref, o_ref):
    # MXU matmul in the inputs' native dtype, f32 accumulation.
    logits = jnp.dot(x_ref[...], w_ref[...], preferred_element_type=jnp.float32)
    logits = logits + b_ref[...]                               # bias already f32
    # Numerically stable softmax over the narrow (unpadded) class axis.
    m = jnp.max(logits, axis=-1, keepdims=True)
    e = jnp.exp(logits - m)
    denom = jnp.sum(e, axis=-1, keepdims=True)
    inv = pl.reciprocal(denom, approx=True)                    # EUP vrcp (free slot)
    inv = inv * (2.0 - denom * inv)                            # one Newton step -> ~f32 accuracy
    o_ref[...] = (e * inv).astype(o_ref.dtype)


def _vmem_budget_bytes():
    """Per-chip VMEM budget for the kernel's resident working set."""
    try:
        cap = int(pltpu.get_tpu_info().vmem_capacity_bytes)
    except Exception:
        cap = 64 * 1024 * 1024          # conservative (v7x-sized) fallback for the query only
    # ~32 MiB on v7x (64 MiB physical / TC), ~40 MiB on v5e / v6e (128 MiB).
    return min(cap // 2, 40 * 1024 * 1024)


def decoder_forward(x, w, b, *, block_b=None):
    """softmax(x @ w + b, axis=-1).  x: (B, K); w: (K, nc); b: (nc,) or (1, nc)."""
    B, K = x.shape
    Kw, nc = w.shape
    assert Kw == K, "weight must be stored as (K, nc) (transposed vs. torch Linear)"
    b = jnp.reshape(b, (1, nc)).astype(jnp.float32)            # pre-cast: no per-tile cast in-kernel

    itemsize = jnp.dtype(x.dtype).itemsize
    sub = _SUBLANE * max(1, 4 // itemsize)                     # 8 rows f32 / 16 rows bf16

    # Honest, lane-rounded VMEM estimate.  x and out are double-buffered by the
    # pipeline; weight + bias are grid-invariant residents (2 buffers each).
    k_lanes = _round_up(K, _LANE)
    nc_lanes = _round_up(nc, _LANE)
    resident = 2 * (_round_up(K, _SUBLANE) * nc_lanes * jnp.dtype(w.dtype).itemsize
                    + _SUBLANE * nc_lanes * 4)

    def tile_bytes(tb):
        return 2 * tb * (k_lanes + nc_lanes) * itemsize + resident

    if block_b is None:
        block_b = 4096 * max(1, 4 // itemsize)                 # 4096 f32 / 8192 bf16 rows
    block_b = min(block_b, _round_up(B, sub))
    if B > sub:
        # Keep >= 2 grid steps so ("parallel",) can shard the batch across the
        # two TensorCores on megacore parts (v7x); negligible cost elsewhere.
        block_b = min(block_b, _round_up(pl.cdiv(B, 2), sub))
    block_b = max(sub, _round_up(block_b, sub))

    budget = _vmem_budget_bytes()
    while block_b > sub and tile_bytes(block_b) > budget:
        block_b = max(sub, _round_up(block_b // 2, sub))

    grid = (pl.cdiv(B, block_b),)
    vmem_limit = int(min(max(tile_bytes(block_b) + (4 << 20), 16 << 20),
                         budget + (8 << 20)))

    return pl.pallas_call(
        decoder_kernel,
        out_shape=jax.ShapeDtypeStruct((B, nc), x.dtype),
        grid_spec=pltpu.PrefetchScalarGridSpec(
            num_scalar_prefetch=0,
            grid=grid,
            in_specs=[
                pl.BlockSpec((block_b, K), lambda i: (i, 0)),   # x rows (last dim == full K)
                pl.BlockSpec((K, nc), lambda i: (0, 0)),        # resident weight
                pl.BlockSpec((1, nc), lambda i: (0, 0)),        # resident bias (f32)
            ],
            out_specs=pl.BlockSpec((block_b, nc), lambda i: (i, 0)),  # narrow, unpadded output
        ),
        compiler_params=pltpu.CompilerParams(
            dimension_semantics=("parallel",),
            vmem_limit_bytes=vmem_limit,
        ),
    )(x, w, b)


if __name__ == "__main__":
    # Shapes consistent with the module: K=32 features, nc=16 classes.
    K, nc = 32, 16
    key = jax.random.PRNGKey(0)
    kx, kw, kb, kx2 = jax.random.split(key, 4)

    # Deterministic params (PyTorch Linear default scale: U(-1/sqrt(K), 1/sqrt(K))).
    # Weight stored transposed vs. PyTorch as (K, nc) so the kernel does x @ W + b.
    bound = 1.0 / (K ** 0.5)
    w = jax.random.uniform(kw, (K, nc), jnp.float32, minval=-bound, maxval=bound)
    b = jax.random.uniform(kb, (nc,), jnp.float32, minval=-bound, maxval=bound)

    # Small batch.
    B = 8
    x = jax.random.normal(kx, (B, K), jnp.float32)
    out = jax.block_until_ready(decoder_forward(x, w, b))
    ref = jax.nn.softmax(x @ w + b[None, :], axis=1)
    assert out.shape == (B, nc)
    assert jnp.allclose(out, ref, atol=1e-4, rtol=1e-4), "mismatch vs reference (B=8)"
    assert jnp.allclose(jnp.sum(out, axis=1), 1.0, atol=1e-4), "rows must sum to 1"

    # Non-tile-aligned larger batch: exercises grid > 1 and a partial last tile.
    B2 = 300
    x2 = jax.random.normal(kx2, (B2, K), jnp.float32)
    out2 = jax.block_until_ready(decoder_forward(x2, w, b))
    ref2 = jax.nn.softmax(x2 @ w + b[None, :], axis=1)
    assert out2.shape == (B2, nc)
    assert jnp.allclose(out2, ref2, atol=1e-4, rtol=1e-4), "mismatch vs reference (B=300)"

    print("KERNEL_OK")
</pallas_src>

<mosaic_0001>
module attributes {stable_mosaic.version = 11 : i64} {
  func.func @decoder_kernel(%arg0: i32, %arg1: memref<8x32xf32, #tpu.memory_space<vmem>>, %arg2: memref<32x16xf32, #tpu.memory_space<vmem>>, %arg3: memref<1x16xf32, #tpu.memory_space<vmem>>, %arg4: memref<8x16xf32, #tpu.memory_space<vmem>>) attributes {dimension_semantics = [#tpu.dimension_semantics<parallel>], iteration_bounds = array<i64: 1>, scalar_prefetch = 0 : i64, scratch_operands = 0 : i64, tpu.core_type = #tpu.core_type<tc>, window_params = [{transform_indices = @transform_0, window_bounds = array<i64: 8, 32>}, {pipeline_mode = #tpu.pipeline_mode<synchronous>, transform_indices = @transform_1, window_bounds = array<i64: 32, 16>}, {pipeline_mode = #tpu.pipeline_mode<synchronous>, transform_indices = @transform_2, window_bounds = array<i64: 1, 16>}, {transform_indices = @transform_3, window_bounds = array<i64: 8, 16>}]} {
    %c0 = arith.constant 0 : index
    %c0_0 = arith.constant 0 : index
    %0 = vector.load %arg1[%c0, %c0_0] : memref<8x32xf32, #tpu.memory_space<vmem>>, vector<8x32xf32>
    %c0_1 = arith.constant 0 : index
    %c0_2 = arith.constant 0 : index
    %1 = vector.load %arg2[%c0_1, %c0_2] : memref<32x16xf32, #tpu.memory_space<vmem>>, vector<32x16xf32>
    %cst = arith.constant dense<0.000000e+00> : vector<8x16xf32>
    %2 = tpu.matmul %0, %1, %cst {dimension_numbers = #tpu.dot_dimension_numbers<[1], [0], [0], [1], [0, 0, 1, 1], [], []>} : vector<8x32xf32>, vector<32x16xf32>, vector<8x16xf32> -> vector<8x16xf32>
    %c0_3 = arith.constant 0 : index
    %c0_4 = arith.constant 0 : index
    %3 = vector.load %arg3[%c0_3, %c0_4] : memref<1x16xf32, #tpu.memory_space<vmem>>, vector<1x16xf32>
    %4 = vector.broadcast %3 : vector<1x16xf32> to vector<8x16xf32>
    %5 = arith.addf %2, %4 : vector<8x16xf32>
    %cst_5 = arith.constant dense<0xFF800000> : vector<8xf32>
    %6 = vector.multi_reduction <maximumf>, %5, %cst_5 [1] : vector<8x16xf32> to vector<8xf32>
    %7 = vector.shape_cast %6 : vector<8xf32> to vector<8x1xf32>
    %8 = vector.broadcast %7 : vector<8x1xf32> to vector<8x16xf32>
    %9 = arith.subf %5, %8 : vector<8x16xf32>
    %10 = math.exp %9 : vector<8x16xf32>
    %cst_6 = arith.constant dense<0.000000e+00> : vector<8xf32>
    %11 = vector.multi_reduction <add>, %10, %cst_6 [1] : vector<8x16xf32> to vector<8xf32>
    %12 = vector.shape_cast %11 : vector<8xf32> to vector<8x1xf32>
    %13 = tpu.reciprocal %12 {approx = true} : vector<8x1xf32> -> vector<8x1xf32>
    %14 = arith.mulf %12, %13 : vector<8x1xf32>
    %cst_7 = arith.constant 2.000000e+00 : f32
    %15 = vector.broadcast %cst_7 : f32 to vector<8x1xf32>
    %16 = arith.subf %15, %14 : vector<8x1xf32>
    %17 = arith.mulf %13, %16 : vector<8x1xf32>
    %18 = vector.broadcast %17 : vector<8x1xf32> to vector<8x16xf32>
    %19 = arith.mulf %10, %18 : vector<8x16xf32>
    %c0_8 = arith.constant 0 : index
    %c0_9 = arith.constant 0 : index
    %20 = vector.load %arg4[%c0_8, %c0_9] : memref<8x16xf32, #tpu.memory_space<vmem>>, vector<8x16xf32>
    tpu.vector_store %arg4[%c0_8, %c0_9], %19 {strides = array<i32>} : memref<8x16xf32, #tpu.memory_space<vmem>>, vector<8x16xf32>,
    return
  }
  func.func @transform_0(%arg0: i32) -> (i32, i32) {
    %c0_i32 = arith.constant 0 : i32
    %c0_i32_0 = arith.constant 0 : i32
    return %arg0, %c0_i32 : i32, i32
  }
  func.func @transform_1(%arg0: i32) -> (i32, i32) {
    %c0_i32 = arith.constant 0 : i32
    %c0_i32_0 = arith.constant 0 : i32
    %c0_i32_1 = arith.constant 0 : i32
    return %c0_i32, %c0_i32_0 : i32, i32
  }
  func.func @transform_2(%arg0: i32) -> (i32, i32) {
    %c0_i32 = arith.constant 0 : i32
    %c0_i32_0 = arith.constant 0 : i32
    %c0_i32_1 = arith.constant 0 : i32
    return %c0_i32, %c0_i32_0 : i32, i32
  }
  func.func @transform_3(%arg0: i32) -> (i32, i32) {
    %c0_i32 = arith.constant 0 : i32
    %c0_i32_0 = arith.constant 0 : i32
    return %arg0, %c0_i32 : i32, i32
  }
}

</mosaic_0001>

<bundles_post_ra>
// kernel: tpu_custom_call.1
= control target key start
LH: loop header
LB: loop body
LE: loop exit
PB: predicated region body
PF: predicated region fallthrough
CT: control target
= control target key end

     0   :  { %s158_s0 = inlined_call_operand.vmem [shape: f32[8,32], index: 0, kind: input, shape index: {}]   ;;  %s159_s1 = inlined_call_operand.vmem [shape: f32[32,16], index: 1, kind: input, shape index: {}]   ;;  %s160_s2 = inlined_call_operand.vmem [shape: f32[1,16], index: 2, kind: input, shape index: {}]   ;;  %s161_s3 = inlined_call_operand.hbm [shape: f32[8,16], index: 3, kind: output, shape index: {}]  }
   0x1   :  { %v19_v0 = vld [vmem:[%s159_s1 + $0x18] sm:$0xff]  ;;  %v18_v1 = vld [vmem:[%s159_s1 + $0x10] sm:$0xff]  ;;  %v17_v2 = vld [vmem:[%s159_s1 + $0x8] sm:$0xff] }
   0x2   :  { %40 = vmatpush.msra.mxu0 %v19_v0 }
   0x3   :  { %8 = vsyncpa [#allocation3], 0  ;;  %v16_v3 = vld [vmem:[%s159_s1] sm:$0xff]  ;;  %vm24_vm0 = vcmask 261120   ;;  %vm48_vm1 = vcmask 130048   ;;  %s71_s25 = sshll.u32 %s161_s3, 4  ;;  %s72_s25 = int_to_ptr.hbm [resolvable:$true] %s71_s25 }
   0x4   :  { %41 = vmatpush.msra.mxu0 %v18_v1  ;;  %v15_v4 = vld [vmem:[%s158_s0] sm:$0xff]  ;;  %s113_s0 = smov [#allocation2]  }
   0x5   :  { %v82_v5 = vld [vmem:[%s160_s2] ss:$0 sm:$0xff]  ;;  %s69_s1 = sshll.u32 %s113_s0, 4  ;;  %s70_s1 = int_to_ptr.vmem [resolvable:$true] %s69_s1 }
   0x6   :  { %42 = vmatpush.msra.mxu0 %v17_v2 }
   0x8   :  { %43 = vmatpush.msra.mxu0 %v16_v3 }
   0x9   :  { %80 = vmatmul.msk.f32.vlgmr.msra.gmra.mxu0 %vm24_vm0, %v15_v4 }
  0x86   :  { %v45_v6 = vpop.f32.mrf.mxu0 }
  0x87   :  { %v46_v7 = vadd.f32 %v82_v5, %v45_v6 }
  0x89   :  { %v49_v8 = vsel %vm48_vm1, %v46_v7, -inf }
  0x8a   :  { %50 = vmax.xlane.f32.xlu0 %v49_v8 }
  0xfd   :  { %v51_v9 = vpop.xlane.xlu0 %50 }
  0xfe   :  { %v52_v10 = vsub.f32 %v46_v7, %v51_v9 }
 0x100   :  { %v53_v11 = vmul.f32 1.442695, %v52_v10 }
 0x102   :  { %83 = vpow2.f32 %v53_v11 }
 0x108   :  { %v84_v12 = vpop.eup %83 }
 0x109   :  { %v55_v13 = vsel %vm48_vm1, %v84_v12, 0.0 }
 0x10a   :  { %56 = vadd.xlane.f32.xlu0 %v55_v13 }
 0x17d   :  { %v57_v14 = vpop.xlane.xlu0 %56 }
 0x17e   :  { %85 = vrcp.f32 %v57_v14 }
 0x184   :  { %v86_v15 = vpop.eup %85 }
 0x185   :  { %v59_v16 = vmul.f32 %v86_v15, %v57_v14 }
 0x187   :  { %v60_v17 = vsub.f32 2.0, %v59_v16 }
 0x189   :  { %v61_v18 = vmul.f32 %v86_v15, %v60_v17 }
 0x18b   :  { %v62_v19 = vmul.f32 %v84_v12, %v61_v18 }
 0x18d   :  { %63 = vst.msk [vmem:[#allocation2] sm:$0xff] %vm48_vm1, %v62_v19 }
 0x18e   :  { %74 = dma.vmem_to_hbm [thread:$0]  %s70_s1, 128, %s72_s25, [#allocation3]  }
 0x18f   :  { %111 = dma.done.wait [#allocation3], 128  }
 0x190   :  { %112 = vsyncadd [#allocation3], 4294967168 }
 0x191   :  { %79 = vsyncpa [#allocation3], 1 }

</bundles_post_ra>
